<compile_context>
chip_gen: v7x
topology: tpu7x:2x2x1
jax: 0.10.0
libtpu: 0.0.40
codegen_flags: <defaults>
</compile_context>

<pallas_src>
import functools

import jax
import jax.numpy as jnp
from jax.experimental import pallas as pl
from jax.experimental.pallas import tpu as pltpu


# ---------------------------------------------------------------------------
# Pallas kernel: one tile of batch rows (each row = one flattened sample)
# ---------------------------------------------------------------------------
def _layernorm_kernel(x_ref, g_ref, b_ref, o_ref, *, eps, n_valid):
    # x_ref: (TB, D) rows of flattened samples
    # g_ref: (1,  D) gamma broadcast to full width
    # b_ref: (1,  D) beta  broadcast to full width
    # o_ref: (TB, D)
    x = x_ref[...].astype(jnp.float32)
    mean = jnp.mean(x, axis=1, keepdims=True)              # (TB, 1) lane reduce (XLU)
    diff = x - mean
    denom = float(max(n_valid - 1, 1))                     # unbiased std (torch default)
    var = jnp.sum(diff * diff, axis=1, keepdims=True) / denom
    std = jnp.sqrt(var)
    y = diff / (std + eps)                                 # eps added to std, per spec
    o_ref[...] = (y * g_ref[...] + b_ref[...]).astype(o_ref.dtype)


def _choose_row_tile(batch):
    if batch <= 8:
        return batch                       # single block; block dim == full array dim
    for tb in (512, 256, 128, 64, 32, 16, 8):   # fat tiles amortize per-step overhead
        if tb <= batch:
            return tb
    return 8


@functools.partial(jax.jit, static_argnames=("eps", "affine"))
def layer_norm_forward(x, gamma=None, beta=None, *, eps=1e-5, affine=True):
    """Equivalent of LayerNorm(num_features=x.shape[1], eps, affine).forward(x).

    x:     (B, C, *spatial) float
    gamma: (C,) float   (required if affine=True)
    beta:  (C,) float   (required if affine=True)
    """
    orig_shape = x.shape
    orig_dtype = x.dtype
    B = orig_shape[0]
    C = orig_shape[1]
    D = 1
    for s in orig_shape[1:]:
        D *= s
    spatial = D // C

    # --- wrapper-side layout plumbing: flatten per sample, pre-broadcast params ---
    x2d = x.reshape(B, D).astype(jnp.float32)
    if affine:
        # matches gamma.view(1, C, 1, ..., 1) broadcast over spatial dims in NCHW order
        g_row = jnp.repeat(gamma.astype(jnp.float32), spatial).reshape(1, D)
        b_row = jnp.repeat(beta.astype(jnp.float32), spatial).reshape(1, D)
    else:
        g_row = jnp.ones((1, D), jnp.float32)
        b_row = jnp.zeros((1, D), jnp.float32)

    TB = _choose_row_tile(B)
    B_pad = ((B + TB - 1) // TB) * TB
    if B_pad != B:
        # zero rows normalize to beta (finite), then get sliced off below
        x2d = jnp.pad(x2d, ((0, B_pad - B), (0, 0)))

    grid = (B_pad // TB,)
    kernel = functools.partial(_layernorm_kernel, eps=float(eps), n_valid=D)

    out2d = pl.pallas_call(
        kernel,
        out_shape=jax.ShapeDtypeStruct((B_pad, D), jnp.float32),
        grid_spec=pltpu.PrefetchScalarGridSpec(
            num_scalar_prefetch=0,
            grid=grid,
            in_specs=[
                pl.BlockSpec((TB, D), lambda i: (i, 0)),   # sample rows tile
                pl.BlockSpec((1, D), lambda i: (0, 0)),    # gamma row (resident)
                pl.BlockSpec((1, D), lambda i: (0, 0)),    # beta row  (resident)
            ],
            out_specs=pl.BlockSpec((TB, D), lambda i: (i, 0)),
        ),
        compiler_params=pltpu.CompilerParams(
            dimension_semantics=("parallel",),   # rows independent -> v7x megacore
        ),
    )(x2d, g_row, b_row)

    out2d = out2d[:B]                            # drop row padding (if any)
    return out2d.reshape(orig_shape).astype(orig_dtype)


if __name__ == "__main__":
    key = jax.random.PRNGKey(0)
    kx, kg = jax.random.split(key, 2)

    # Small shapes consistent with the module: batch=2, num_features(C)=4, 16x16 spatial.
    B, C, H, W = 2, 4, 16, 16
    eps = 1e-5

    x = jax.random.normal(kx, (B, C, H, W), dtype=jnp.float32)
    gamma = jax.random.uniform(kg, (C,), jnp.float32, 0.0, 1.0)   # torch .uniform_()
    beta = jnp.zeros((C,), jnp.float32)                           # torch.zeros

    out = layer_norm_forward(x, gamma, beta, eps=eps, affine=True)
    jax.block_until_ready(out)

    # Pure-JAX reference matching PyTorch LayerNorm.forward exactly.
    xf = x.reshape(B, -1)
    mean = xf.mean(axis=1).reshape(B, 1, 1, 1)
    std = jnp.std(xf, axis=1, ddof=1).reshape(B, 1, 1, 1)        # unbiased, like torch.std
    ref = (x - mean) / (std + eps)
    ref = ref * gamma.reshape(1, C, 1, 1) + beta.reshape(1, C, 1, 1)

    assert out.shape == (B, C, H, W)
    assert jnp.allclose(out, ref, atol=1e-4, rtol=1e-4)

    print("KERNEL_OK")
</pallas_src>

<mosaic_0001>
module attributes {stable_mosaic.version = 11 : i64} {
  func.func @_layernorm_kernel(%arg0: i32, %arg1: memref<2x1024xf32, #tpu.memory_space<vmem>>, %arg2: memref<1x1024xf32, #tpu.memory_space<vmem>>, %arg3: memref<1x1024xf32, #tpu.memory_space<vmem>>, %arg4: memref<2x1024xf32, #tpu.memory_space<vmem>>) attributes {dimension_semantics = [#tpu.dimension_semantics<parallel>], iteration_bounds = array<i64: 1>, scalar_prefetch = 0 : i64, scratch_operands = 0 : i64, tpu.core_type = #tpu.core_type<tc>, window_params = [{transform_indices = @transform_0, window_bounds = array<i64: 2, 1024>}, {pipeline_mode = #tpu.pipeline_mode<synchronous>, transform_indices = @transform_1, window_bounds = array<i64: 1, 1024>}, {pipeline_mode = #tpu.pipeline_mode<synchronous>, transform_indices = @transform_2, window_bounds = array<i64: 1, 1024>}, {transform_indices = @transform_3, window_bounds = array<i64: 2, 1024>}]} {
    %c0 = arith.constant 0 : index
    %c0_0 = arith.constant 0 : index
    %0 = vector.load %arg1[%c0, %c0_0] : memref<2x1024xf32, #tpu.memory_space<vmem>>, vector<2x1024xf32>
    %cst = arith.constant dense<0.000000e+00> : vector<2xf32>
    %1 = vector.multi_reduction <add>, %0, %cst [1] : vector<2x1024xf32> to vector<2xf32>
    %2 = vector.shape_cast %1 : vector<2xf32> to vector<2x1xf32>
    %cst_1 = arith.constant 1.024000e+03 : f32
    %3 = vector.broadcast %cst_1 : f32 to vector<2x1xf32>
    %4 = arith.divf %2, %3 : vector<2x1xf32>
    %5 = vector.broadcast %4 : vector<2x1xf32> to vector<2x1024xf32>
    %6 = arith.subf %0, %5 : vector<2x1024xf32>
    %7 = arith.mulf %6, %6 : vector<2x1024xf32>
    %cst_2 = arith.constant dense<0.000000e+00> : vector<2xf32>
    %8 = vector.multi_reduction <add>, %7, %cst_2 [1] : vector<2x1024xf32> to vector<2xf32>
    %9 = vector.shape_cast %8 : vector<2xf32> to vector<2x1xf32>
    %cst_3 = arith.constant 1.023000e+03 : f32
    %10 = vector.broadcast %cst_3 : f32 to vector<2x1xf32>
    %11 = arith.divf %9, %10 : vector<2x1xf32>
    %12 = math.sqrt %11 : vector<2x1xf32>
    %cst_4 = arith.constant 9.99999974E-6 : f32
    %13 = vector.broadcast %cst_4 : f32 to vector<2x1xf32>
    %14 = arith.addf %12, %13 : vector<2x1xf32>
    %15 = vector.broadcast %14 : vector<2x1xf32> to vector<2x1024xf32>
    %16 = arith.divf %6, %15 : vector<2x1024xf32>
    %c0_5 = arith.constant 0 : index
    %c0_6 = arith.constant 0 : index
    %17 = vector.load %arg2[%c0_5, %c0_6] : memref<1x1024xf32, #tpu.memory_space<vmem>>, vector<1x1024xf32>
    %18 = vector.broadcast %17 : vector<1x1024xf32> to vector<2x1024xf32>
    %19 = arith.mulf %16, %18 : vector<2x1024xf32>
    %c0_7 = arith.constant 0 : index
    %c0_8 = arith.constant 0 : index
    %20 = vector.load %arg3[%c0_7, %c0_8] : memref<1x1024xf32, #tpu.memory_space<vmem>>, vector<1x1024xf32>
    %21 = vector.broadcast %20 : vector<1x1024xf32> to vector<2x1024xf32>
    %22 = arith.addf %19, %21 : vector<2x1024xf32>
    %c0_9 = arith.constant 0 : index
    %c0_10 = arith.constant 0 : index
    %23 = vector.load %arg4[%c0_9, %c0_10] : memref<2x1024xf32, #tpu.memory_space<vmem>>, vector<2x1024xf32>
    tpu.vector_store %arg4[%c0_9, %c0_10], %22 {strides = array<i32>} : memref<2x1024xf32, #tpu.memory_space<vmem>>, vector<2x1024xf32>,
    return
  }
  func.func @transform_0(%arg0: i32) -> (i32, i32) {
    %c0_i32 = arith.constant 0 : i32
    %c0_i32_0 = arith.constant 0 : i32
    return %arg0, %c0_i32 : i32, i32
  }
  func.func @transform_1(%arg0: i32) -> (i32, i32) {
    %c0_i32 = arith.constant 0 : i32
    %c0_i32_0 = arith.constant 0 : i32
    %c0_i32_1 = arith.constant 0 : i32
    return %c0_i32, %c0_i32_0 : i32, i32
  }
  func.func @transform_2(%arg0: i32) -> (i32, i32) {
    %c0_i32 = arith.constant 0 : i32
    %c0_i32_0 = arith.constant 0 : i32
    %c0_i32_1 = arith.constant 0 : i32
    return %c0_i32, %c0_i32_0 : i32, i32
  }
  func.func @transform_3(%arg0: i32) -> (i32, i32) {
    %c0_i32 = arith.constant 0 : i32
    %c0_i32_0 = arith.constant 0 : i32
    return %arg0, %c0_i32 : i32, i32
  }
}

</mosaic_0001>

<bundles_post_ra>
// kernel: layer_norm_forward.1
= control target key start
LH: loop header
LB: loop body
LE: loop exit
PB: predicated region body
PF: predicated region fallthrough
CT: control target
= control target key end

     0   :  { %v22_v0 = vlaneseq  ;;  %v334_v1 = vmov 1983009808   ;;  %vm60_vm0 = vcmask 1041408   ;;  %v335_v33 = vmov 269488144   ;;  %s434_s0 = inlined_call_operand.vmem [shape: f32[2,1024], index: 0, kind: input, shape index: {}]   ;;  %s435_s1 = inlined_call_operand.vmem [shape: f32[1,1024], index: 1, kind: input, shape index: {}]   ;;  %s436_s2 = inlined_call_operand.vmem [shape: f32[1,1024], index: 2, kind: input, shape index: {}]   ;;  %s437_s3 = inlined_call_operand.vmem [shape: f32[2,1024], index: 3, kind: output, shape index: {}]  }
   0x1   :  { %v20_v2 = vunpack.c.l.s4 %v334_v1  ;;  %v14_v3 = vld [vmem:[%s434_s0] sm:$0xff]  ;;  %v15_v8 = vld [vmem:[%s434_s0 + $0x8] sm:$0xff]  ;;  %v82_v34 = vunpack.c.l.s4 %v335_v33 }
   0x2   :  { %v359_v4 = vshrl.u32 %v22_v0, 7  ;;  %v18_v5 = vcombine.high %v14_v3, %v14_v3  ;;  %v35_v13 = vcombine.high %v15_v8, %v15_v8 }
   0x3   :  { %v21_v6 = vunpack.c.0.s8 %v20_v2  ;;  %v83_v35 = vunpack.c.0.s8 %v82_v34 }
   0x5   :  { %v362_v7 = vsub.s32 %v21_v6, %v359_v4  ;;  %v380_v36 = vsub.s32 %v83_v35, %v359_v4 }
   0x7   :  { %v25_v9 = vrot.slane %v14_v3, %v362_v7  ;;  %v32_v10 = vrot.slane %v18_v5, %v362_v7  ;;  %v42_v14 = vrot.slane %v15_v8, %v362_v7  ;;  %v49_v19 = vrot.slane %v35_v13, %v362_v7  ;;  %v176_v13 = vld [vmem:[%s435_s1] sm:$0xff] }
   0x9   :  { %v33_v11 = vcombine.high %v25_v9, %v25_v9  ;;  %v34_v12 = vcombine.high %v32_v10, %v32_v10  ;;  %v61_v15 = vsel %vm60_vm0, %v25_v9, 0.0  ;;  %v64_v17 = vsel %vm60_vm0, %v32_v10, 0.0 }
   0xa   :  { %v50_v20 = vcombine.high %v42_v14, %v42_v14  ;;  %v68_v23 = vsel %vm60_vm0, %v42_v14, 0.0  ;;  %v51_v25 = vcombine.high %v49_v19, %v49_v19  ;;  %v72_v28 = vsel %vm60_vm0, %v49_v19, 0.0 }
   0xb   :  { %v62_v16 = vsel %vm60_vm0, %v33_v11, 0.0  ;;  %v66_v21 = vsel %vm60_vm0, %v34_v12, 0.0  ;;  %v180_v10 = vsub.s32 0, %v359_v4  ;;  %v184_v11 = vsub.s32 1, %v359_v4 }
   0xc   :  { %v63_v18 = vadd.f32 %v62_v16, %v61_v15  ;;  %v70_v26 = vsel %vm60_vm0, %v50_v20, 0.0  ;;  %v74_v30 = vsel %vm60_vm0, %v51_v25, 0.0  ;;  %v188_v12 = vsub.s32 2, %v359_v4 }
   0xd   :  { %v192_v14 = vsub.s32 3, %v359_v4  ;;  %v196_v15 = vsub.s32 4, %v359_v4  ;;  %v200_v16 = vsub.s32 5, %v359_v4  ;;  %v208_v19 = vsub.s32 7, %v359_v4 }
   0xe   :  { %v65_v22 = vadd.f32 %v64_v17, %v63_v18  ;;  %v204_v18 = vsub.s32 6, %v359_v4 }
  0x10   :  { %v67_v24 = vadd.f32 %v66_v21, %v65_v22  ;;  %v248_v21 = vld [vmem:[%s436_s2] sm:$0xff] }
  0x11   :  { %v253_v33 = vrot.slane %v248_v21, %v180_v10  ;;  %v257_v4 = vrot.slane %v248_v21, %v184_v11  ;;  %v261_v34 = vrot.slane %v248_v21, %v188_v12  ;;  %v265_v35 = vrot.slane %v248_v21, %v192_v14 }
  0x12   :  { %v69_v27 = vadd.f32 %v68_v23, %v67_v24  ;;  %v181_v23 = vrot.slane %v176_v13, %v180_v10  ;;  %v185_v24 = vrot.slane %v176_v13, %v184_v11 }
  0x14   :  { %v71_v29 = vadd.f32 %v70_v26, %v69_v27  ;;  %v189_v26 = vrot.slane %v176_v13, %v188_v12  ;;  %v193_v27 = vrot.slane %v176_v13, %v192_v14 }
  0x16   :  { %v73_v31 = vadd.f32 %v72_v28, %v71_v29  ;;  %v197_v28 = vrot.slane %v176_v13, %v196_v15 }
  0x18   :  { %v75_v32 = vadd.f32 %v74_v30, %v73_v31  ;;  %v201_v30 = vrot.slane %v176_v13, %v200_v16  ;;  %v205_v31 = vrot.slane %v176_v13, %v204_v18 }
  0x1a   :  { %76 = vadd.xlane.f32.xlu0 %v75_v32  ;;  %v209_v32 = vrot.slane %v176_v13, %v208_v19 }
  0xa7   :  { %v77_v37 = vpop.xlane.xlu0 %76 }
  0xa8   :  { %v79_v38 = vmul.f32 0.0009765625, %v77_v37 }
  0xaa   :  { %v87_v39 = vrot.slane %v79_v38, %v380_v36  ;;  %v269_v38 = vrot.slane %v248_v21, %v196_v15 }
  0xac   :  { %v383_v40 = vsub.f32 %v14_v3, %v87_v39  ;;  %v385_v41 = vsub.f32 %v15_v8, %v87_v39  ;;  %v273_v39 = vrot.slane %v248_v21, %v200_v16 }
  0xae   :  { %v91_v42 = vmul.f32 %v383_v40, %v383_v40  ;;  %v92_v43 = vmul.f32 %v385_v41, %v385_v41 }
  0xb0   :  { %v95_v44 = vcombine.high %v91_v42, %v91_v42  ;;  %v102_v45 = vrot.slane %v91_v42, %v362_v7  ;;  %v119_v48 = vrot.slane %v92_v43, %v362_v7  ;;  %v112_v52 = vcombine.high %v92_v43, %v92_v43 }
  0xb1   :  { %v277_v42 = vrot.slane %v248_v21, %v204_v18  ;;  %v281_v43 = vrot.slane %v248_v21, %v208_v19 }
  0xb2   :  { %v109_v46 = vrot.slane %v95_v44, %v362_v7  ;;  %v110_v47 = vcombine.high %v102_v45, %v102_v45  ;;  %v137_v49 = vsel %vm60_vm0, %v102_v45, 0.0  ;;  %v126_v56 = vrot.slane %v112_v52, %v362_v7 }
  0xb3   :  { %v127_v57 = vcombine.high %v119_v48, %v119_v48  ;;  %v144_v60 = vsel %vm60_vm0, %v119_v48, 0.0  ;;  %v210_v44 = vcombine.low %v181_v23, %v185_v24  ;;  %v211_v45 = vcombine.low %v189_v26, %v193_v27 }
  0xb4   :  { %v138_v50 = vsel %vm60_vm0, %v110_v47, 0.0  ;;  %v111_v51 = vcombine.high %v109_v46, %v109_v46  ;;  %v140_v54 = vsel %vm60_vm0, %v109_v46, 0.0  ;;  %v128_v62 = vcombine.high %v126_v56, %v126_v56 }
  0xb5   :  { %v139_v53 = vadd.f32 %v138_v50, %v137_v49  ;;  %v146_v63 = vsel %vm60_vm0, %v127_v57, 0.0  ;;  %v148_v1 = vsel %vm60_vm0, %v126_v56, 0.0  ;;  %v227_v46 = vcombine.low %v197_v28, %v201_v30 }
  0xb6   :  { %v142_v58 = vsel %vm60_vm0, %v111_v51, 0.0  ;;  %v150_v3 = vsel %vm60_vm0, %v128_v62, 0.0  ;;  %v228_v47 = vcombine.low %v205_v31, %v209_v32  ;;  %v282_v48 = vcombine.low %v253_v33, %v257_v4 }
  0xb7   :  { %v141_v55 = vadd.f32 %v140_v54, %v139_v53  ;;  %v283_v49 = vcombine.low %v261_v34, %v265_v35  ;;  %v299_v50 = vcombine.low %v269_v38, %v273_v39  ;;  %v300_v51 = vcombine.low %v277_v42, %v281_v43 }
  0xb8   :  { %v218_v52 = vrot.slane %v210_v44, %v362_v7  ;;  %v225_v53 = vrot.slane %v211_v45, %v362_v7  ;;  %v235_v54 = vrot.slane %v227_v46, %v362_v7 }
  0xb9   :  { %v143_v59 = vadd.f32 %v142_v58, %v141_v55  ;;  %v290_v55 = vrot.slane %v282_v48, %v362_v7  ;;  %v297_v56 = vrot.slane %v283_v49, %v362_v7  ;;  %v307_v57 = vrot.slane %v299_v50, %v362_v7 }
  0xba   :  { %v314_v58 = vrot.slane %v300_v51, %v362_v7 }
  0xbb   :  { %v145_v61 = vadd.f32 %v144_v60, %v143_v59  ;;  %v226_v59 = vcombine.low %v218_v52, %v225_v53  ;;  %v298_v62 = vcombine.low %v290_v55, %v297_v56 }
  0xbd   :  { %v147_v0 = vadd.f32 %v146_v63, %v145_v61  ;;  %v315_v63 = vcombine.low %v307_v57, %v314_v58 }
  0xbf   :  { %v149_v2 = vadd.f32 %v148_v1, %v147_v0 }
  0xc1   :  { %v151_v5 = vadd.f32 %v150_v3, %v149_v2 }
  0xc3   :  { %152 = vadd.xlane.f32.xlu0 %v151_v5 }
 0x150   :  { %v153_v6 = vpop.xlane.xlu0 %152 }
 0x151   :  { %v155_v8 = vmul.f32 0.0009775171, %v153_v6 }
 0x153   :  { %330 = vrsqrt.f32 %v155_v8  ;;  %vm158_vm1 = vcmp.eq.f32.partialorder %v155_v8, inf  ;;  %v161_v20 = vand.u32 2147483648, %v155_v8  ;;  %vm160_vm2 = vcmp.eq.f32.partialorder %v155_v8, 0.0 }
 0x15d   :  { %v331_v9 = vpop.eup %330 }
 0x15e   :  { %v157_v17 = vmul.f32 %v331_v9, %v155_v8 }
 0x160   :  { %v159_v22 = vsel %vm158_vm1, %v155_v8, %v157_v17 }
 0x161   :  { %v162_v25 = vsel %vm160_vm2, %v161_v20, %v159_v22 }
 0x162   :  { %v163_v29 = vadd.f32 1e-05, %v162_v25 }
 0x164   :  { %v171_v37 = vrot.slane %v163_v29, %v380_v36  ;;  %v242_v36 = vrot.slane %v228_v47, %v362_v7 }
 0x166   :  { %332 = vrcp.f32 %v171_v37  ;;  %v243_v60 = vcombine.low %v235_v54, %v242_v36 }
 0x170   :  { %v333_v61 = vpop.eup %332 }
 0x171   :  { %v174_v0 = vmul.f32 %v333_v61, %v383_v40  ;;  %v175_v1 = vmul.f32 %v333_v61, %v385_v41 }
 0x173   :  { %v246_v2 = vmul.f32 %v226_v59, %v174_v0  ;;  %v247_v3 = vmul.f32 %v243_v60, %v175_v1 }
 0x175   :  { %v318_v5 = vadd.f32 %v298_v62, %v246_v2  ;;  %v319_v6 = vadd.f32 %v315_v63, %v247_v3 }
 0x177   :  { %320 = vst [vmem:[%s437_s3] sm:$0xff] %v318_v5  ;;  %321 = vst [vmem:[%s437_s3 + $0x8] sm:$0xff] %v319_v6 }

</bundles_post_ra>
